<compile_context>
chip_gen: v6e
topology: v6e:2x2x1
jax: 0.10.0
libtpu: 0.0.40
codegen_flags: <defaults>
</compile_context>

<pallas_src>
import jax
import jax.numpy as jnp
from jax import lax
from jax.experimental import pallas as pl
from jax.experimental.pallas import tpu as pltpu

HIDDEN = 20


def deep_rnn_kernel(pre_x_ref, whh0_ref, w1_ref, b1_ref, wfc_ref, bfc_ref,
                    out_ref):
    # pre_x_ref: (S, B, H)  = x_t * W_ih0^T + b_ih0 + b_hh0  (precomputed)
    # whh0_ref:  (H, H)     = W_hh_l0^T
    # w1_ref:    (2H, H)    = [W_ih_l1 ; W_hh_l1]^T   (row-stacked)
    # b1_ref:    (1, H)     = b_ih_l1 + b_hh_l1
    # wfc_ref:   (H, 1)     = W_fc^T,   bfc_ref: (1, 1)
    S, B, H = pre_x_ref.shape

    whh0 = whh0_ref[...]
    w1 = w1_ref[...]
    b1 = b1_ref[...]

    def step(t, carry):
        h1, h2 = carry
        # layer 0: h1_t = tanh(pre_x[t] + h1_{t-1} @ W_hh0^T)
        pre1 = pre_x_ref[t] + jnp.dot(h1, whh0,
                                      preferred_element_type=jnp.float32)
        h1n = jnp.tanh(pre1)
        # layer 1 (fused): h2_t = tanh([h1_t, h2_{t-1}] @ [W_ih1; W_hh1]^T + b1)
        hcat = jnp.concatenate([h1n, h2], axis=-1)          # (B, 2H)
        pre2 = jnp.dot(hcat, w1, preferred_element_type=jnp.float32) + b1
        h2n = jnp.tanh(pre2)
        return h1n, h2n

    h_init = jnp.zeros((B, H), jnp.float32)
    # S is static and small: fully unroll so the serial chain gets pipelined.
    _, h2_last = lax.fori_loop(0, S, step, (h_init, h_init), unroll=True)

    # fc on the last timestep of the top layer: (B, H) @ (H, 1) + (1, 1)
    out_ref[...] = (jnp.dot(h2_last, wfc_ref[...],
                            preferred_element_type=jnp.float32)
                    + bfc_ref[...])


def init_params(key, hidden=HIDDEN):
    """Deterministic params, mimicking PyTorch's U(-1/sqrt(H), 1/sqrt(H)) init."""
    bound = 1.0 / jnp.sqrt(jnp.float32(hidden))
    ks = jax.random.split(key, 11)
    u = lambda k, shape: jax.random.uniform(k, shape, jnp.float32, -bound, bound)
    return {
        "wih0": u(ks[0], (hidden, 1)),
        "whh0": u(ks[1], (hidden, hidden)),
        "bih0": u(ks[2], (hidden,)),
        "bhh0": u(ks[3], (hidden,)),
        "wih1": u(ks[4], (hidden, hidden)),
        "whh1": u(ks[5], (hidden, hidden)),
        "bih1": u(ks[6], (hidden,)),
        "bhh1": u(ks[7], (hidden,)),
        "wfc": u(ks[8], (1, hidden)),
        "bfc": u(ks[9], (1,)),
    }


def deep_rnn_forward(x, p):
    """x: (B, S, 1) float32 (PyTorch batch_first layout). Returns (B, 1)."""
    B, S, _ = x.shape
    H = p["whh0"].shape[0]

    x_tm = jnp.transpose(x, (1, 0, 2)).astype(jnp.float32)    # (S, B, 1)

    # Hoist the layer-0 input projection + both layer-0 biases out of the
    # recurrence (lane-dense H on the last axis).
    pre_x = (x_tm * p["wih0"].reshape(1, 1, H)
             + (p["bih0"] + p["bhh0"]).reshape(1, 1, H))       # (S, B, H)

    # Fused layer-1 weight [W_ih1 ; W_hh1]^T and pre-summed bias.
    w1 = jnp.concatenate([p["wih1"], p["whh1"]], axis=1).T     # (2H, H)
    b1 = (p["bih1"] + p["bhh1"]).reshape(1, H)                 # (1, H)

    ins = (
        pre_x,
        p["whh0"].T,            # (H, H)
        w1,                     # (2H, H)
        b1,                     # (1, H)
        p["wfc"].T,             # (H, 1)
        p["bfc"].reshape(1, 1), # (1, 1)
    )

    vmem = pl.BlockSpec(memory_space=pltpu.MemorySpace.VMEM)
    return pl.pallas_call(
        deep_rnn_kernel,
        out_shape=jax.ShapeDtypeStruct((B, 1), jnp.float32),
        in_specs=[vmem] * len(ins),
        out_specs=vmem,
    )(*ins)


def deep_rnn_reference(x, p):
    """Pure-JAX reference with identical semantics to torch.nn.RNN + Linear."""
    B, S, _ = x.shape
    H = p["whh0"].shape[0]

    def step(carry, xt):
        h1, h2 = carry
        h1 = jnp.tanh(xt @ p["wih0"].T + p["bih0"] + h1 @ p["whh0"].T + p["bhh0"])
        h2 = jnp.tanh(h1 @ p["wih1"].T + p["bih1"] + h2 @ p["whh1"].T + p["bhh1"])
        return (h1, h2), None

    h0 = jnp.zeros((B, H), jnp.float32)
    (_, h2_last), _ = lax.scan(step, (h0, h0), jnp.transpose(x, (1, 0, 2)))
    return h2_last @ p["wfc"].T + p["bfc"]


if __name__ == "__main__":
    key = jax.random.PRNGKey(0)
    k_param, k_x = jax.random.split(key)

    B, S = 4, 8                      # batch=4, seq_len=8, input_size=1
    params = init_params(k_param)
    x = jax.random.normal(k_x, (B, S, 1), jnp.float32)

    out = deep_rnn_forward(x, params)
    out = jax.block_until_ready(out)

    ref = deep_rnn_reference(x, params)
    assert out.shape == (B, 1)
    assert jnp.allclose(out, ref, rtol=1e-5, atol=1e-5), (out, ref)

    print("KERNEL_OK")
</pallas_src>

<mosaic_0001>
module attributes {stable_mosaic.version = 11 : i64} {
  func.func @deep_rnn_kernel(%arg0: memref<8x4x20xf32, #tpu.memory_space<vmem>>, %arg1: memref<20x20xf32, #tpu.memory_space<vmem>>, %arg2: memref<40x20xf32, #tpu.memory_space<vmem>>, %arg3: memref<1x20xf32, #tpu.memory_space<vmem>>, %arg4: memref<20x1xf32, #tpu.memory_space<vmem>>, %arg5: memref<1x1xf32, #tpu.memory_space<vmem>>, %arg6: memref<4x1xf32, #tpu.memory_space<vmem>>) attributes {dimension_semantics = [], scalar_prefetch = 0 : i64, scratch_operands = 0 : i64, tpu.core_type = #tpu.core_type<tc>} {
    %c0 = arith.constant 0 : index
    %c0_0 = arith.constant 0 : index
    %0 = vector.load %arg1[%c0, %c0_0] : memref<20x20xf32, #tpu.memory_space<vmem>>, vector<20x20xf32>
    %c0_1 = arith.constant 0 : index
    %c0_2 = arith.constant 0 : index
    %1 = vector.load %arg2[%c0_1, %c0_2] : memref<40x20xf32, #tpu.memory_space<vmem>>, vector<40x20xf32>
    %c0_3 = arith.constant 0 : index
    %c0_4 = arith.constant 0 : index
    %2 = vector.load %arg3[%c0_3, %c0_4] : memref<1x20xf32, #tpu.memory_space<vmem>>, vector<1x20xf32>
    %cst = arith.constant 0.000000e+00 : f32
    %3 = vector.broadcast %cst : f32 to vector<4x20xf32>
    %c0_i32 = arith.constant 0 : i32
    %4 = arith.index_cast %c0_i32 : i32 to index
    %c0_5 = arith.constant 0 : index
    %c0_6 = arith.constant 0 : index
    %5 = vector.load %arg0[%4, %c0_5, %c0_6] : memref<8x4x20xf32, #tpu.memory_space<vmem>>, vector<1x4x20xf32>
    %6 = vector.shape_cast %5 : vector<1x4x20xf32> to vector<4x20xf32>
    %cst_7 = arith.constant dense<0.000000e+00> : vector<4x20xf32>
    %7 = tpu.matmul %3, %0, %cst_7 {dimension_numbers = #tpu.dot_dimension_numbers<[1], [0], [0], [1], [0, 0, 1, 1], [], []>} : vector<4x20xf32>, vector<20x20xf32>, vector<4x20xf32> -> vector<4x20xf32>
    %8 = arith.addf %6, %7 : vector<4x20xf32>
    %9 = math.tanh %8 : vector<4x20xf32>
    %10 = tpu.concatenate %9, %3 in 1 : vector<4x20xf32>, vector<4x20xf32> -> vector<4x40xf32>
    %cst_8 = arith.constant dense<0.000000e+00> : vector<4x20xf32>
    %11 = tpu.matmul %10, %1, %cst_8 {dimension_numbers = #tpu.dot_dimension_numbers<[1], [0], [0], [1], [0, 0, 1, 1], [], []>} : vector<4x40xf32>, vector<40x20xf32>, vector<4x20xf32> -> vector<4x20xf32>
    %12 = vector.broadcast %2 : vector<1x20xf32> to vector<4x20xf32>
    %13 = arith.addf %11, %12 : vector<4x20xf32>
    %14 = math.tanh %13 : vector<4x20xf32>
    %c1_i32 = arith.constant 1 : i32
    %15 = arith.index_cast %c1_i32 : i32 to index
    %c0_9 = arith.constant 0 : index
    %c0_10 = arith.constant 0 : index
    %16 = vector.load %arg0[%15, %c0_9, %c0_10] : memref<8x4x20xf32, #tpu.memory_space<vmem>>, vector<1x4x20xf32>
    %17 = vector.shape_cast %16 : vector<1x4x20xf32> to vector<4x20xf32>
    %cst_11 = arith.constant dense<0.000000e+00> : vector<4x20xf32>
    %18 = tpu.matmul %9, %0, %cst_11 {dimension_numbers = #tpu.dot_dimension_numbers<[1], [0], [0], [1], [0, 0, 1, 1], [], []>} : vector<4x20xf32>, vector<20x20xf32>, vector<4x20xf32> -> vector<4x20xf32>
    %19 = arith.addf %17, %18 : vector<4x20xf32>
    %20 = math.tanh %19 : vector<4x20xf32>
    %21 = tpu.concatenate %20, %14 in 1 : vector<4x20xf32>, vector<4x20xf32> -> vector<4x40xf32>
    %cst_12 = arith.constant dense<0.000000e+00> : vector<4x20xf32>
    %22 = tpu.matmul %21, %1, %cst_12 {dimension_numbers = #tpu.dot_dimension_numbers<[1], [0], [0], [1], [0, 0, 1, 1], [], []>} : vector<4x40xf32>, vector<40x20xf32>, vector<4x20xf32> -> vector<4x20xf32>
    %23 = vector.broadcast %2 : vector<1x20xf32> to vector<4x20xf32>
    %24 = arith.addf %22, %23 : vector<4x20xf32>
    %25 = math.tanh %24 : vector<4x20xf32>
    %c2_i32 = arith.constant 2 : i32
    %26 = arith.index_cast %c2_i32 : i32 to index
    %c0_13 = arith.constant 0 : index
    %c0_14 = arith.constant 0 : index
    %27 = vector.load %arg0[%26, %c0_13, %c0_14] : memref<8x4x20xf32, #tpu.memory_space<vmem>>, vector<1x4x20xf32>
    %28 = vector.shape_cast %27 : vector<1x4x20xf32> to vector<4x20xf32>
    %cst_15 = arith.constant dense<0.000000e+00> : vector<4x20xf32>
    %29 = tpu.matmul %20, %0, %cst_15 {dimension_numbers = #tpu.dot_dimension_numbers<[1], [0], [0], [1], [0, 0, 1, 1], [], []>} : vector<4x20xf32>, vector<20x20xf32>, vector<4x20xf32> -> vector<4x20xf32>
    %30 = arith.addf %28, %29 : vector<4x20xf32>
    %31 = math.tanh %30 : vector<4x20xf32>
    %32 = tpu.concatenate %31, %25 in 1 : vector<4x20xf32>, vector<4x20xf32> -> vector<4x40xf32>
    %cst_16 = arith.constant dense<0.000000e+00> : vector<4x20xf32>
    %33 = tpu.matmul %32, %1, %cst_16 {dimension_numbers = #tpu.dot_dimension_numbers<[1], [0], [0], [1], [0, 0, 1, 1], [], []>} : vector<4x40xf32>, vector<40x20xf32>, vector<4x20xf32> -> vector<4x20xf32>
    %34 = vector.broadcast %2 : vector<1x20xf32> to vector<4x20xf32>
    %35 = arith.addf %33, %34 : vector<4x20xf32>
    %36 = math.tanh %35 : vector<4x20xf32>
    %c3_i32 = arith.constant 3 : i32
    %37 = arith.index_cast %c3_i32 : i32 to index
    %c0_17 = arith.constant 0 : index
    %c0_18 = arith.constant 0 : index
    %38 = vector.load %arg0[%37, %c0_17, %c0_18] : memref<8x4x20xf32, #tpu.memory_space<vmem>>, vector<1x4x20xf32>
    %39 = vector.shape_cast %38 : vector<1x4x20xf32> to vector<4x20xf32>
    %cst_19 = arith.constant dense<0.000000e+00> : vector<4x20xf32>
    %40 = tpu.matmul %31, %0, %cst_19 {dimension_numbers = #tpu.dot_dimension_numbers<[1], [0], [0], [1], [0, 0, 1, 1], [], []>} : vector<4x20xf32>, vector<20x20xf32>, vector<4x20xf32> -> vector<4x20xf32>
    %41 = arith.addf %39, %40 : vector<4x20xf32>
    %42 = math.tanh %41 : vector<4x20xf32>
    %43 = tpu.concatenate %42, %36 in 1 : vector<4x20xf32>, vector<4x20xf32> -> vector<4x40xf32>
    %cst_20 = arith.constant dense<0.000000e+00> : vector<4x20xf32>
    %44 = tpu.matmul %43, %1, %cst_20 {dimension_numbers = #tpu.dot_dimension_numbers<[1], [0], [0], [1], [0, 0, 1, 1], [], []>} : vector<4x40xf32>, vector<40x20xf32>, vector<4x20xf32> -> vector<4x20xf32>
    %45 = vector.broadcast %2 : vector<1x20xf32> to vector<4x20xf32>
    %46 = arith.addf %44, %45 : vector<4x20xf32>
    %47 = math.tanh %46 : vector<4x20xf32>
    %c4_i32 = arith.constant 4 : i32
    %48 = arith.index_cast %c4_i32 : i32 to index
    %c0_21 = arith.constant 0 : index
    %c0_22 = arith.constant 0 : index
    %49 = vector.load %arg0[%48, %c0_21, %c0_22] : memref<8x4x20xf32, #tpu.memory_space<vmem>>, vector<1x4x20xf32>
    %50 = vector.shape_cast %49 : vector<1x4x20xf32> to vector<4x20xf32>
    %cst_23 = arith.constant dense<0.000000e+00> : vector<4x20xf32>
    %51 = tpu.matmul %42, %0, %cst_23 {dimension_numbers = #tpu.dot_dimension_numbers<[1], [0], [0], [1], [0, 0, 1, 1], [], []>} : vector<4x20xf32>, vector<20x20xf32>, vector<4x20xf32> -> vector<4x20xf32>
    %52 = arith.addf %50, %51 : vector<4x20xf32>
    %53 = math.tanh %52 : vector<4x20xf32>
    %54 = tpu.concatenate %53, %47 in 1 : vector<4x20xf32>, vector<4x20xf32> -> vector<4x40xf32>
    %cst_24 = arith.constant dense<0.000000e+00> : vector<4x20xf32>
    %55 = tpu.matmul %54, %1, %cst_24 {dimension_numbers = #tpu.dot_dimension_numbers<[1], [0], [0], [1], [0, 0, 1, 1], [], []>} : vector<4x40xf32>, vector<40x20xf32>, vector<4x20xf32> -> vector<4x20xf32>
    %56 = vector.broadcast %2 : vector<1x20xf32> to vector<4x20xf32>
    %57 = arith.addf %55, %56 : vector<4x20xf32>
    %58 = math.tanh %57 : vector<4x20xf32>
    %c5_i32 = arith.constant 5 : i32
    %59 = arith.index_cast %c5_i32 : i32 to index
    %c0_25 = arith.constant 0 : index
    %c0_26 = arith.constant 0 : index
    %60 = vector.load %arg0[%59, %c0_25, %c0_26] : memref<8x4x20xf32, #tpu.memory_space<vmem>>, vector<1x4x20xf32>
    %61 = vector.shape_cast %60 : vector<1x4x20xf32> to vector<4x20xf32>
    %cst_27 = arith.constant dense<0.000000e+00> : vector<4x20xf32>
    %62 = tpu.matmul %53, %0, %cst_27 {dimension_numbers = #tpu.dot_dimension_numbers<[1], [0], [0], [1], [0, 0, 1, 1], [], []>} : vector<4x20xf32>, vector<20x20xf32>, vector<4x20xf32> -> vector<4x20xf32>
    %63 = arith.addf %61, %62 : vector<4x20xf32>
    %64 = math.tanh %63 : vector<4x20xf32>
    %65 = tpu.concatenate %64, %58 in 1 : vector<4x20xf32>, vector<4x20xf32> -> vector<4x40xf32>
    %cst_28 = arith.constant dense<0.000000e+00> : vector<4x20xf32>
    %66 = tpu.matmul %65, %1, %cst_28 {dimension_numbers = #tpu.dot_dimension_numbers<[1], [0], [0], [1], [0, 0, 1, 1], [], []>} : vector<4x40xf32>, vector<40x20xf32>, vector<4x20xf32> -> vector<4x20xf32>
    %67 = vector.broadcast %2 : vector<1x20xf32> to vector<4x20xf32>
    %68 = arith.addf %66, %67 : vector<4x20xf32>
    %69 = math.tanh %68 : vector<4x20xf32>
    %c6_i32 = arith.constant 6 : i32
    %70 = arith.index_cast %c6_i32 : i32 to index
    %c0_29 = arith.constant 0 : index
    %c0_30 = arith.constant 0 : index
    %71 = vector.load %arg0[%70, %c0_29, %c0_30] : memref<8x4x20xf32, #tpu.memory_space<vmem>>, vector<1x4x20xf32>
    %72 = vector.shape_cast %71 : vector<1x4x20xf32> to vector<4x20xf32>
    %cst_31 = arith.constant dense<0.000000e+00> : vector<4x20xf32>
    %73 = tpu.matmul %64, %0, %cst_31 {dimension_numbers = #tpu.dot_dimension_numbers<[1], [0], [0], [1], [0, 0, 1, 1], [], []>} : vector<4x20xf32>, vector<20x20xf32>, vector<4x20xf32> -> vector<4x20xf32>
    %74 = arith.addf %72, %73 : vector<4x20xf32>
    %75 = math.tanh %74 : vector<4x20xf32>
    %76 = tpu.concatenate %75, %69 in 1 : vector<4x20xf32>, vector<4x20xf32> -> vector<4x40xf32>
    %cst_32 = arith.constant dense<0.000000e+00> : vector<4x20xf32>
    %77 = tpu.matmul %76, %1, %cst_32 {dimension_numbers = #tpu.dot_dimension_numbers<[1], [0], [0], [1], [0, 0, 1, 1], [], []>} : vector<4x40xf32>, vector<40x20xf32>, vector<4x20xf32> -> vector<4x20xf32>
    %78 = vector.broadcast %2 : vector<1x20xf32> to vector<4x20xf32>
    %79 = arith.addf %77, %78 : vector<4x20xf32>
    %80 = math.tanh %79 : vector<4x20xf32>
    %c7_i32 = arith.constant 7 : i32
    %81 = arith.index_cast %c7_i32 : i32 to index
    %c0_33 = arith.constant 0 : index
    %c0_34 = arith.constant 0 : index
    %82 = vector.load %arg0[%81, %c0_33, %c0_34] : memref<8x4x20xf32, #tpu.memory_space<vmem>>, vector<1x4x20xf32>
    %83 = vector.shape_cast %82 : vector<1x4x20xf32> to vector<4x20xf32>
    %cst_35 = arith.constant dense<0.000000e+00> : vector<4x20xf32>
    %84 = tpu.matmul %75, %0, %cst_35 {dimension_numbers = #tpu.dot_dimension_numbers<[1], [0], [0], [1], [0, 0, 1, 1], [], []>} : vector<4x20xf32>, vector<20x20xf32>, vector<4x20xf32> -> vector<4x20xf32>
    %85 = arith.addf %83, %84 : vector<4x20xf32>
    %86 = math.tanh %85 : vector<4x20xf32>
    %87 = tpu.concatenate %86, %80 in 1 : vector<4x20xf32>, vector<4x20xf32> -> vector<4x40xf32>
    %cst_36 = arith.constant dense<0.000000e+00> : vector<4x20xf32>
    %88 = tpu.matmul %87, %1, %cst_36 {dimension_numbers = #tpu.dot_dimension_numbers<[1], [0], [0], [1], [0, 0, 1, 1], [], []>} : vector<4x40xf32>, vector<40x20xf32>, vector<4x20xf32> -> vector<4x20xf32>
    %89 = vector.broadcast %2 : vector<1x20xf32> to vector<4x20xf32>
    %90 = arith.addf %88, %89 : vector<4x20xf32>
    %91 = math.tanh %90 : vector<4x20xf32>
    %c8_i32 = arith.constant 8 : i32
    %c0_37 = arith.constant 0 : index
    %c0_38 = arith.constant 0 : index
    %92 = vector.load %arg4[%c0_37, %c0_38] : memref<20x1xf32, #tpu.memory_space<vmem>>, vector<20x1xf32>
    %cst_39 = arith.constant dense<0.000000e+00> : vector<4x1xf32>
    %93 = tpu.matmul %91, %92, %cst_39 {dimension_numbers = #tpu.dot_dimension_numbers<[1], [0], [0], [1], [0, 0, 1, 1], [], []>} : vector<4x20xf32>, vector<20x1xf32>, vector<4x1xf32> -> vector<4x1xf32>
    %c0_40 = arith.constant 0 : index
    %c0_41 = arith.constant 0 : index
    %94 = vector.load %arg5[%c0_40, %c0_41] : memref<1x1xf32, #tpu.memory_space<vmem>>, vector<1x1xf32>
    %95 = vector.broadcast %94 : vector<1x1xf32> to vector<4x1xf32>
    %96 = arith.addf %93, %95 : vector<4x1xf32>
    %c0_42 = arith.constant 0 : index
    %c0_43 = arith.constant 0 : index
    %97 = vector.load %arg6[%c0_42, %c0_43] : memref<4x1xf32, #tpu.memory_space<vmem>>, vector<4x1xf32>
    tpu.vector_store %arg6[%c0_42, %c0_43], %96 {strides = array<i32>} : memref<4x1xf32, #tpu.memory_space<vmem>>, vector<4x1xf32>,
    return
  }
}

</mosaic_0001>

<bundles_post_ra>
// kernel: tpu_custom_call.1
= control target key start
LH: loop header
LB: loop body
LE: loop exit
PB: predicated region body
PF: predicated region fallthrough
CT: control target
= control target key end

     0   :  { %vm39_vm0 = vcmask 1043456   ;;  %v1719_v0 = vmov 0.0   ;;  %vm1720_vm1 = vmmov 0   ;;  %vm35_vm2 = vcmask 162816   ;;  %s1721_s17 = smov 20   ;;  %s2055_s1 = inlined_call_operand.vmem [shape: f32[20,20], index: 1, kind: input, shape index: {}]   ;;  %s2056_s2 = inlined_call_operand.vmem [shape: f32[40,20], index: 2, kind: input, shape index: {}]   ;;  %s2057_s0 = inlined_call_operand.vmem [shape: f32[8,4,20], index: 0, kind: input, shape index: {}]   ;;  %s2058_s3 = inlined_call_operand.vmem [shape: f32[1,20], index: 3, kind: input, shape index: {}]   ;;  %s2059_s4 = inlined_call_operand.vmem [shape: f32[20,1], index: 4, kind: input, shape index: {}]   ;;  %s2060_s5 = inlined_call_operand.<no memory space> [shape: f32[1,1], index: 5, kind: input, shape index: {}]   ;;  %s2061_s6 = inlined_call_operand.vmem [shape: f32[4,1], index: 6, kind: output, shape index: {}]  }
   0x1   :  { %1499 = vmatprep.subr.mxu0 %v1719_v0  ;;  %v1761_v1 = vld [vmem:[%s2055_s1 + $0x10] sm:$0xf]  ;;  %v1766_v2 = vld [vmem:[%s2055_s1 + $0x8] sm:$0xff]  ;;  %1505 = vmatprep.mubr.msk.f32.mxu0 %vm1720_vm1, %v1719_v0  ;;  %v1777_v3 = vld [vmem:[%s2055_s1] sm:$0xff]  ;;  %vm122_vm3 = vcmask 326656   ;;  %vm1375_vm4 = vcmask 3072  }
   0x2   :  { %1500 = vmatpush3.msk.msra.mxu0 %vm39_vm0, %v1761_v1  ;;  %1508 = vmatprep.subr.mxu1 %v1719_v0  ;;  %v1798_v4 = vld [vmem:[%s2056_s2 + $0x20] sm:$0xff]  ;;  %v1803_v5 = vld [vmem:[%s2056_s2 + $0x18] sm:$0xff]  ;;  %v1810_v6 = vld [vmem:[%s2056_s2 + $0x10] sm:$0xff] }
   0x3   :  { %1501 = vmatprep.subr.mxu0 %v1719_v0  ;;  %1518 = vmatprep.mubr.msk.f32.mxu1 %vm1720_vm1, %v1719_v0  ;;  %v1817_v7 = vld [vmem:[%s2056_s2 + $0x8] sm:$0xff]  ;;  %v1824_v8 = vld [vmem:[%s2056_s2] sm:$0xff]  ;;  %v1396_v49 = vld [vmem:[%s2057_s0 + $0x10] sm:$0xf] }
   0x4   :  { %1502 = vmatpush3.msra.mxu0 %v1766_v2  ;;  %1509 = vmatpush3.msra.mxu1 %v1798_v4  ;;  %v34_v9 = vld [vmem:[%s2057_s0] sm:$0xf]  ;;  %v1384_v15 = vld [vmem:[%s2057_s0 + $0x4] sm:$0xf]  ;;  %v1388_v27 = vld [vmem:[%s2057_s0 + $0x8] sm:$0xf] }
   0x5   :  { %1503 = vmatprep.subr.mxu0 %v1719_v0  ;;  %1510 = vmatprep.subr.mxu1 %v1719_v0  ;;  %v1863_v16 = vld [vmem:[%s2058_s3] ss:$0 sm:$0xff]  ;;  %v1392_v38 = vld [vmem:[%s2057_s0 + $0xc] sm:$0xf]  ;;  %v1400_v60 = vld [vmem:[%s2057_s0 + $0x14] sm:$0xf] }
   0x6   :  { %1504 = vmatpush3.msra.mxu0 %v1777_v3  ;;  %1511 = vmatpush3.msra.mxu1 %v1803_v5 }
   0x7   :  { %1506 = vmatmul.mubr.f32.vlgmr.msra.gmra.mxu0 %v1719_v0  ;;  %1521 = vmatprep.subr.mxu0 %v1719_v0 }
   0x8   :  { %1522 = vmatpush3.msk.msra.mxu0 %vm39_vm0, %v1761_v1  ;;  %1527 = vmatprep.mubr.msk.f32.mxu0 %vm1720_vm1, %v1719_v0 }
   0x9   :  { %1523 = vmatprep.subr.mxu0 %v1719_v0  ;;  %1512 = vmatprep.subr.mxu1 %v1719_v0 }
   0xa   :  { %1524 = vmatpush3.msra.mxu0 %v1766_v2  ;;  %1513 = vmatpush3.msra.mxu1 %v1810_v6 }
   0xb   :  { %1525 = vmatprep.subr.mxu0 %v1719_v0  ;;  %1514 = vmatprep.subr.mxu1 %v1719_v0 }
   0xc   :  { %1526 = vmatpush3.msra.mxu0 %v1777_v3  ;;  %1515 = vmatpush3.msra.mxu1 %v1817_v7 }
   0xd   :  { %1543 = vmatprep.subr.mxu0 %v1719_v0  ;;  %1516 = vmatprep.subr.mxu1 %v1719_v0 }
   0xe   :  { %1517 = vmatpush3.msra.mxu1 %v1824_v8 }
   0xf   :  { %1530 = vmatprep.subr.mxu1 %v1719_v0 }
  0xc7   :  { %v109_v10 = vpop.f32.mrf.mxu0 }
  0xc8   :  { %v113_v11 = vadd.f32 %v109_v10, %v34_v9 }
  0xc9   :  { %v1507_v12 = vpop.f32.mrf.mxu0 }
  0xca   :  { %1687 = vtanh.f32 %v113_v11 }
  0xd7   :  { %v1688_v13 = vpop.eup %1687 }
  0xd8   :  { %1528 = vmatmul.mubr.msk.f32.vlgmr.msra.gmra.mxu0 %vm35_vm2, %v1688_v13  ;;  %v115_v14 = vsel %vm35_vm2, %v1688_v13, 0.0 }
  0xd9   :  { %1519 = vmatmul.mubr.msk.f32.vlgmr.msra.gmra.mxu1 %vm122_vm3, %v115_v14  ;;  %1544 = vmatpush3.msk.msra.mxu0 %vm39_vm0, %v1761_v1 }
  0xda   :  { %1545 = vmatprep.subr.mxu0 %v1719_v0  ;;  %1549 = vmatprep.mubr.msk.f32.mxu0 %vm1720_vm1, %v1719_v0 }
  0xdb   :  { %1546 = vmatpush3.msra.mxu0 %v1766_v2  ;;  %1531 = vmatpush3.msra.mxu1 %v1798_v4 }
  0xdc   :  { %1547 = vmatprep.subr.mxu0 %v1719_v0  ;;  %1532 = vmatprep.subr.mxu1 %v1719_v0 }
  0xdd   :  { %1548 = vmatpush3.msra.mxu0 %v1777_v3  ;;  %1533 = vmatpush3.msra.mxu1 %v1803_v5 }
  0xde   :  { %1534 = vmatprep.subr.mxu1 %v1719_v0  ;;  %1540 = vmatprep.mubr.msk.f32.mxu1 %vm1720_vm1, %v1719_v0 }
  0xdf   :  { %1535 = vmatpush3.msra.mxu1 %v1810_v6  ;;  %1552 = vmatprep.subr.mxu0 %v1719_v0 }
  0xe0   :  { %1536 = vmatprep.subr.mxu1 %v1719_v0 }
  0xe1   :  { %1537 = vmatpush3.msra.mxu1 %v1817_v7 }
  0xe2   :  { %1538 = vmatprep.subr.mxu1 %v1719_v0 }
  0xe3   :  { %1539 = vmatpush3.msra.mxu1 %v1824_v8 }
  0xe4   :  { %1565 = vmatprep.subr.mxu1 %v1719_v0 }
 0x198   :  { %v268_v17 = vpop.f32.mrf.mxu0 }
 0x199   :  { %v272_v18 = vadd.f32 %v1384_v15, %v268_v17  ;;  %v192_v19 = vpop.f32.mrf.mxu1  ;;  %v1404_v17 = vld [vmem:[%s2057_s0 + $0x18] sm:$0xf] }
 0x19a   :  { %v193_v20 = vadd.f32 %v1863_v16, %v192_v19  ;;  %v1529_v21 = vpop.f32.mrf.mxu0 }
 0x19b   :  { %1689 = vtanh.f32 %v272_v18  ;;  %v1520_v22 = vpop.f32.mrf.mxu1 }
 0x19c   :  { %1691 = vtanh.f32 %v193_v20 }
 0x1a8   :  { %v1690_v23 = vpop.eup %1689 }
 0x1a9   :  { %v1692_v24 = vpop.eup %1691  ;;  %1550 = vmatmul.mubr.msk.f32.vlgmr.msra.gmra.mxu0 %vm35_vm2, %v1690_v23 }
 0x1aa   :  { %275 = vrot.lane.b32.xlu0 %v1692_v24, %s1721_s17  ;;  %1553 = vmatpush3.msra.mxu0 %v1798_v4 }
 0x1ab   :  { %1554 = vmatprep.subr.mxu0 %v1719_v0  ;;  %1562 = vmatprep.mubr.msk.f32.mxu0 %vm1720_vm1, %v1719_v0 }
 0x1ac   :  { %1555 = vmatpush3.msra.mxu0 %v1803_v5 }
 0x1ad   :  { %1556 = vmatprep.subr.mxu0 %v1719_v0 }
 0x1ae   :  { %1557 = vmatpush3.msra.mxu0 %v1810_v6 }
 0x1af   :  { %1558 = vmatprep.subr.mxu0 %v1719_v0 }
 0x1b0   :  { %1559 = vmatpush3.msra.mxu0 %v1817_v7 }
 0x1b1   :  { %1560 = vmatprep.subr.mxu0 %v1719_v0 }
 0x1b2   :  { %1561 = vmatpush3.msra.mxu0 %v1824_v8 }
 0x1b3   :  { %1587 = vmatprep.subr.mxu0 %v1719_v0 }
 0x21c   :  { %v276_v25 = vpop.permute.xlu0 %275 }
 0x21d   :  { %v278_v26 = vsel %vm35_vm2, %v1690_v23, %v276_v25 }
 0x21e   :  { %1541 = vmatmul.mubr.msk.f32.vlgmr.msra.gmra.mxu1 %vm122_vm3, %v278_v26  ;;  %v1408_v26 = vld [vmem:[%s2057_s0 + $0x1c] sm:$0xf] }
 0x21f   :  { %1566 = vmatpush3.msk.msra.mxu1 %vm39_vm0, %v1761_v1  ;;  %1571 = vmatprep.mubr.msk.f32.mxu1 %vm1720_vm1, %v1719_v0 }
 0x220   :  { %1567 = vmatprep.subr.mxu1 %v1719_v0 }
 0x221   :  { %1568 = vmatpush3.msra.mxu1 %v1766_v2 }
 0x222   :  { %1569 = vmatprep.subr.mxu1 %v1719_v0 }
 0x223   :  { %1570 = vmatpush3.msra.mxu1 %v1777_v3 }
 0x224   :  { %1574 = vmatprep.subr.mxu1 %v1719_v0 }
 0x269   :  { %v424_v28 = vpop.f32.mrf.mxu0 }
 0x26a   :  { %v428_v29 = vadd.f32 %v1388_v27, %v424_v28 }
 0x26b   :  { %v1551_v30 = vpop.f32.mrf.mxu0 }
 0x26c   :  { %1693 = vtanh.f32 %v428_v29 }
 0x279   :  { %v1694_v31 = vpop.eup %1693 }
 0x27a   :  { %1572 = vmatmul.mubr.msk.f32.vlgmr.msra.gmra.mxu1 %vm35_vm2, %v1694_v31 }
 0x27b   :  { %1575 = vmatpush3.msra.mxu1 %v1798_v4  ;;  %1584 = vmatprep.mubr.msk.f32.mxu1 %vm1720_vm1, %v1719_v0 }
 0x27c   :  { %1576 = vmatprep.subr.mxu1 %v1719_v0 }
 0x27d   :  { %1577 = vmatpush3.msra.mxu1 %v1803_v5 }
 0x27e   :  { %1578 = vmatprep.subr.mxu1 %v1719_v0 }
 0x27f   :  { %1579 = vmatpush3.msra.mxu1 %v1810_v6 }
 0x280   :  { %1580 = vmatprep.subr.mxu1 %v1719_v0 }
 0x281   :  { %1581 = vmatpush3.msra.mxu1 %v1817_v7 }
 0x282   :  { %1582 = vmatprep.subr.mxu1 %v1719_v0 }
 0x283   :  { %1583 = vmatpush3.msra.mxu1 %v1824_v8 }
 0x284   :  { %1609 = vmatprep.subr.mxu1 %v1719_v0 }
 0x2de   :  { %v348_v32 = vpop.f32.mrf.mxu1 }
 0x2df   :  { %v349_v33 = vadd.f32 %v1863_v16, %v348_v32  ;;  %v1290_v32 = vld [vmem:[%s2059_s4 + $0x8] sm:$0xff] }
 0x2e0   :  { %v1542_v34 = vpop.f32.mrf.mxu1 }
 0x2e1   :  { %1695 = vtanh.f32 %v349_v33  ;;  %v1289_v33 = vld [vmem:[%s2059_s4] sm:$0xff]  ;;  %v11_v34 = vstv %s2060_s5 }
 0x2e2   :  { %12 = vst [vmem:[#allocation2] sm:$0x1] %v11_v34 }
 0x2ee   :  { %v1696_v35 = vpop.eup %1695 }
 0x2ef   :  { %431 = vrot.lane.b32.xlu0 %v1696_v35, %s1721_s17 }
 0x33a   :  { %v580_v36 = vpop.f32.mrf.mxu1 }
 0x33b   :  { %v584_v39 = vadd.f32 %v1392_v38, %v580_v36 }
 0x33c   :  { %v1573_v37 = vpop.f32.mrf.mxu1 }
 0x33d   :  { %1697 = vtanh.f32 %v584_v39  ;;  %v1412_v39 = vld [vmem:[#allocation2] ss:$0 sm:$0xff] }
 0x34a   :  { %v1698_v42 = vpop.eup %1697 }
 0x361   :  { %v432_v40 = vpop.permute.xlu0 %431 }
 0x362   :  { %v434_v41 = vsel %vm35_vm2, %v1694_v31, %v432_v40  ;;  %v1291_v31 = vld [vmem:[%s2059_s4 + $0x10] sm:$0xf] }
 0x363   :  { %1563 = vmatmul.mubr.msk.f32.vlgmr.msra.gmra.mxu0 %vm122_vm3, %v434_v41 }
 0x364   :  { %1588 = vmatpush3.msk.msra.mxu0 %vm39_vm0, %v1761_v1  ;;  %1593 = vmatprep.mubr.msk.f32.mxu0 %vm1720_vm1, %v1719_v0 }
 0x365   :  { %1589 = vmatprep.subr.mxu0 %v1719_v0 }
 0x366   :  { %1590 = vmatpush3.msra.mxu0 %v1766_v2 }
 0x367   :  { %1591 = vmatprep.subr.mxu0 %v1719_v0 }
 0x368   :  { %1592 = vmatpush3.msra.mxu0 %v1777_v3 }
 0x369   :  { %1594 = vmatmul.mubr.msk.f32.vlgmr.msra.gmra.mxu0 %vm35_vm2, %v1698_v42  ;;  %1596 = vmatprep.subr.mxu0 %v1719_v0 }
 0x36a   :  { %1597 = vmatpush3.msra.mxu0 %v1798_v4  ;;  %1606 = vmatprep.mubr.msk.f32.mxu0 %vm1720_vm1, %v1719_v0 }
 0x36b   :  { %1598 = vmatprep.subr.mxu0 %v1719_v0 }
 0x36c   :  { %1599 = vmatpush3.msra.mxu0 %v1803_v5 }
 0x36d   :  { %1600 = vmatprep.subr.mxu0 %v1719_v0 }
 0x36e   :  { %1601 = vmatpush3.msra.mxu0 %v1810_v6 }
 0x36f   :  { %1602 = vmatprep.subr.mxu0 %v1719_v0 }
 0x370   :  { %1603 = vmatpush3.msra.mxu0 %v1817_v7 }
 0x371   :  { %1604 = vmatprep.subr.mxu0 %v1719_v0 }
 0x372   :  { %1605 = vmatpush3.msra.mxu0 %v1824_v8 }
 0x373   :  { %1631 = vmatprep.subr.mxu0 %v1719_v0 }
 0x423   :  { %v504_v43 = vpop.f32.mrf.mxu0 }
 0x424   :  { %v505_v44 = vadd.f32 %v1863_v16, %v504_v43 }
 0x425   :  { %v1564_v45 = vpop.f32.mrf.mxu0 }
 0x426   :  { %1699 = vtanh.f32 %v505_v44 }
 0x429   :  { %v736_v46 = vpop.f32.mrf.mxu0 }
 0x42a   :  { %v740_v50 = vadd.f32 %v1396_v49, %v736_v46 }
 0x42b   :  { %v1595_v47 = vpop.f32.mrf.mxu0 }
 0x42c   :  { %1701 = vtanh.f32 %v740_v50 }
 0x433   :  { %v1700_v48 = vpop.eup %1699 }
 0x434   :  { %587 = vrot.lane.b32.xlu1 %v1700_v48, %s1721_s17 }
 0x439   :  { %v1702_v53 = vpop.eup %1701 }
 0x4a6   :  { %v588_v51 = vpop.permute.xlu1 %587 }
 0x4a7   :  { %v590_v52 = vsel %vm35_vm2, %v1698_v42, %v588_v51 }
 0x4a8   :  { %1585 = vmatmul.mubr.msk.f32.vlgmr.msra.gmra.mxu1 %vm122_vm3, %v590_v52 }
 0x4a9   :  { %1610 = vmatpush3.msk.msra.mxu1 %vm39_vm0, %v1761_v1  ;;  %1615 = vmatprep.mubr.msk.f32.mxu1 %vm1720_vm1, %v1719_v0 }
 0x4aa   :  { %1611 = vmatprep.subr.mxu1 %v1719_v0 }
 0x4ab   :  { %1612 = vmatpush3.msra.mxu1 %v1766_v2 }
 0x4ac   :  { %1613 = vmatprep.subr.mxu1 %v1719_v0 }
 0x4ad   :  { %1614 = vmatpush3.msra.mxu1 %v1777_v3 }
 0x4ae   :  { %1616 = vmatmul.mubr.msk.f32.vlgmr.msra.gmra.mxu1 %vm35_vm2, %v1702_v53  ;;  %1618 = vmatprep.subr.mxu1 %v1719_v0 }
 0x4af   :  { %1619 = vmatpush3.msra.mxu1 %v1798_v4  ;;  %1628 = vmatprep.mubr.msk.f32.mxu1 %vm1720_vm1, %v1719_v0 }
 0x4b0   :  { %1620 = vmatprep.subr.mxu1 %v1719_v0 }
 0x4b1   :  { %1621 = vmatpush3.msra.mxu1 %v1803_v5 }
 0x4b2   :  { %1622 = vmatprep.subr.mxu1 %v1719_v0 }
 0x4b3   :  { %1623 = vmatpush3.msra.mxu1 %v1810_v6 }
 0x4b4   :  { %1624 = vmatprep.subr.mxu1 %v1719_v0 }
 0x4b5   :  { %1625 = vmatpush3.msra.mxu1 %v1817_v7 }
 0x4b6   :  { %1626 = vmatprep.subr.mxu1 %v1719_v0 }
 0x4b7   :  { %1627 = vmatpush3.msra.mxu1 %v1824_v8 }
 0x4b8   :  { %1653 = vmatprep.subr.mxu1 %v1719_v0 }
 0x568   :  { %v660_v54 = vpop.f32.mrf.mxu1 }
 0x569   :  { %v661_v55 = vadd.f32 %v1863_v16, %v660_v54 }
 0x56a   :  { %v1586_v56 = vpop.f32.mrf.mxu1 }
 0x56b   :  { %1703 = vtanh.f32 %v661_v55 }
 0x56e   :  { %v892_v57 = vpop.f32.mrf.mxu1 }
 0x56f   :  { %v896_v61 = vadd.f32 %v1400_v60, %v892_v57 }
 0x570   :  { %v1617_v58 = vpop.f32.mrf.mxu1 }
 0x571   :  { %1705 = vtanh.f32 %v896_v61 }
 0x578   :  { %v1704_v59 = vpop.eup %1703 }
 0x579   :  { %743 = vrot.lane.b32.xlu1 %v1704_v59, %s1721_s17 }
 0x57e   :  { %v1706_v9 = vpop.eup %1705 }
 0x5eb   :  { %v744_v62 = vpop.permute.xlu1 %743 }
 0x5ec   :  { %v746_v63 = vsel %vm35_vm2, %v1702_v53, %v744_v62 }
 0x5ed   :  { %1607 = vmatmul.mubr.msk.f32.vlgmr.msra.gmra.mxu0 %vm122_vm3, %v746_v63 }
 0x5ee   :  { %1632 = vmatpush3.msk.msra.mxu0 %vm39_vm0, %v1761_v1  ;;  %1637 = vmatprep.mubr.msk.f32.mxu0 %vm1720_vm1, %v1719_v0 }
 0x5ef   :  { %1633 = vmatprep.subr.mxu0 %v1719_v0 }
 0x5f0   :  { %1634 = vmatpush3.msra.mxu0 %v1766_v2 }
 0x5f1   :  { %1635 = vmatprep.subr.mxu0 %v1719_v0 }
 0x5f2   :  { %1636 = vmatpush3.msra.mxu0 %v1777_v3 }
 0x5f3   :  { %1638 = vmatmul.mubr.msk.f32.vlgmr.msra.gmra.mxu0 %vm35_vm2, %v1706_v9  ;;  %1640 = vmatprep.subr.mxu0 %v1719_v0 }
 0x5f4   :  { %1641 = vmatpush3.msra.mxu0 %v1798_v4  ;;  %1650 = vmatprep.mubr.msk.f32.mxu0 %vm1720_vm1, %v1719_v0 }
 0x5f5   :  { %1642 = vmatprep.subr.mxu0 %v1719_v0 }
 0x5f6   :  { %1643 = vmatpush3.msra.mxu0 %v1803_v5 }
 0x5f7   :  { %1644 = vmatprep.subr.mxu0 %v1719_v0 }
 0x5f8   :  { %1645 = vmatpush3.msra.mxu0 %v1810_v6 }
 0x5f9   :  { %1646 = vmatprep.subr.mxu0 %v1719_v0 }
 0x5fa   :  { %1647 = vmatpush3.msra.mxu0 %v1817_v7 }
 0x5fb   :  { %1648 = vmatprep.subr.mxu0 %v1719_v0 }
 0x5fc   :  { %1649 = vmatpush3.msra.mxu0 %v1824_v8 }
 0x5fd   :  { %1675 = vmatprep.subr.mxu0 %v1719_v0 }
 0x6ad   :  { %v816_v10 = vpop.f32.mrf.mxu0 }
 0x6ae   :  { %v817_v11 = vadd.f32 %v1863_v16, %v816_v10 }
 0x6af   :  { %v1608_v12 = vpop.f32.mrf.mxu0 }
 0x6b0   :  { %1707 = vtanh.f32 %v817_v11 }
 0x6b3   :  { %v1048_v13 = vpop.f32.mrf.mxu0 }
 0x6b4   :  { %v1052_v18 = vadd.f32 %v1404_v17, %v1048_v13 }
 0x6b5   :  { %v1639_v14 = vpop.f32.mrf.mxu0 }
 0x6b6   :  { %1709 = vtanh.f32 %v1052_v18 }
 0x6bd   :  { %v1708_v15 = vpop.eup %1707 }
 0x6be   :  { %899 = vrot.lane.b32.xlu0 %v1708_v15, %s1721_s17 }
 0x6c3   :  { %v1710_v21 = vpop.eup %1709 }
 0x730   :  { %v900_v19 = vpop.permute.xlu0 %899 }
 0x731   :  { %v902_v20 = vsel %vm35_vm2, %v1706_v9, %v900_v19 }
 0x732   :  { %1629 = vmatmul.mubr.msk.f32.vlgmr.msra.gmra.mxu1 %vm122_vm3, %v902_v20 }
 0x733   :  { %1654 = vmatpush3.msk.msra.mxu1 %vm39_vm0, %v1761_v1  ;;  %1659 = vmatprep.mubr.msk.f32.mxu1 %vm1720_vm1, %v1719_v0 }
 0x734   :  { %1655 = vmatprep.subr.mxu1 %v1719_v0 }
 0x735   :  { %1656 = vmatpush3.msra.mxu1 %v1766_v2 }
 0x736   :  { %1657 = vmatprep.subr.mxu1 %v1719_v0 }
 0x737   :  { %1658 = vmatpush3.msra.mxu1 %v1777_v3 }
 0x738   :  { %1660 = vmatmul.mubr.msk.f32.vlgmr.msra.gmra.mxu1 %vm35_vm2, %v1710_v21  ;;  %1662 = vmatprep.subr.mxu1 %v1719_v0 }
 0x739   :  { %1663 = vmatpush3.msra.mxu1 %v1798_v4  ;;  %1672 = vmatprep.mubr.msk.f32.mxu1 %vm1720_vm1, %v1719_v0 }
 0x73a   :  { %1664 = vmatprep.subr.mxu1 %v1719_v0 }
 0x73b   :  { %1665 = vmatpush3.msra.mxu1 %v1803_v5 }
 0x73c   :  { %1666 = vmatprep.subr.mxu1 %v1719_v0 }
 0x73d   :  { %1667 = vmatpush3.msra.mxu1 %v1810_v6 }
 0x73e   :  { %1668 = vmatprep.subr.mxu1 %v1719_v0 }
 0x73f   :  { %1669 = vmatpush3.msra.mxu1 %v1817_v7 }
 0x740   :  { %1670 = vmatprep.subr.mxu1 %v1719_v0 }
 0x741   :  { %1671 = vmatpush3.msra.mxu1 %v1824_v8 }
 0x7f2   :  { %v972_v1 = vpop.f32.mrf.mxu1 }
 0x7f3   :  { %v973_v2 = vadd.f32 %v1863_v16, %v972_v1 }
 0x7f4   :  { %v1630_v3 = vpop.f32.mrf.mxu1 }
 0x7f5   :  { %1711 = vtanh.f32 %v973_v2 }
 0x7f8   :  { %v1204_v4 = vpop.f32.mrf.mxu1 }
 0x7f9   :  { %v1208_v27 = vadd.f32 %v1408_v26, %v1204_v4 }
 0x7fa   :  { %v1661_v22 = vpop.f32.mrf.mxu1 }
 0x802   :  { %v1712_v5 = vpop.eup %1711 }
 0x803   :  { %1055 = vrot.lane.b32.xlu1 %v1712_v5, %s1721_s17 }
 0x875   :  { %v1056_v23 = vpop.permute.xlu1 %1055 }
 0x876   :  { %v1058_v6 = vsel %vm35_vm2, %v1710_v21, %v1056_v23 }
 0x877   :  { %1651 = vmatmul.mubr.msk.f32.vlgmr.msra.gmra.mxu0 %vm122_vm3, %v1058_v6 }
 0x878   :  { %1681 = vmatprep.mubr.msk.f32.mxu0 %vm1720_vm1, %v1719_v0  ;;  %1676 = vmatpush3.msk.msra.mxu0 %vm39_vm0, %v1291_v31 }
 0x879   :  { %1677 = vmatprep.subr.mxu0 %v1719_v0 }
 0x87a   :  { %1678 = vmatpush3.msra.mxu0 %v1290_v32 }
 0x87b   :  { %1679 = vmatprep.subr.mxu0 %v1719_v0 }
 0x87c   :  { %1680 = vmatpush3.msra.mxu0 %v1289_v33 }
 0x937   :  { %v1128_v7 = vpop.f32.mrf.mxu0 }
 0x938   :  { %v1129_v8 = vadd.f32 %v1863_v16, %v1128_v7 }
 0x939   :  { %v1652_v24 = vpop.f32.mrf.mxu0 }
 0x93a   :  { %1713 = vtanh.f32 %v1129_v8 }
 0x93b   :  { %1715 = vtanh.f32 %v1208_v27 }
 0x947   :  { %v1714_v25 = vpop.eup %1713 }
 0x948   :  { %1211 = vrot.lane.b32.xlu0 %v1714_v25, %s1721_s17  ;;  %v1716_v28 = vpop.eup %1715 }
 0x9ba   :  { %v1212_v29 = vpop.permute.xlu0 %1211 }
 0x9bb   :  { %v1214_v30 = vsel %vm35_vm2, %v1716_v28, %v1212_v29 }
 0x9bc   :  { %1673 = vmatmul.mubr.msk.f32.vlgmr.msra.gmra.mxu1 %vm122_vm3, %v1214_v30 }
 0xa7c   :  { %v1284_v35 = vpop.f32.mrf.mxu1 }
 0xa7d   :  { %v1285_v36 = vadd.f32 %v1863_v16, %v1284_v35 }
 0xa7e   :  { %v1674_v37 = vpop.f32.mrf.mxu1 }
 0xa7f   :  { %1717 = vtanh.f32 %v1285_v36 }
 0xa8c   :  { %v1718_v38 = vpop.eup %1717 }
 0xa8d   :  { %1682 = vmatmul.mubr.msk.f32.vlgmr.msra.gmra.mxu0 %vm35_vm2, %v1718_v38 }
 0xb4d   :  { %v1371_v40 = vpop.f32.mrf.mxu0 }
 0xb4e   :  { %v1372_v41 = vadd.f32 %v1412_v39, %v1371_v40 }
 0xb4f   :  { %v1683_v42 = vpop.f32.mrf.mxu0 }
 0xb50   :  { %1376 = vst.msk [vmem:[%s2061_s6] sm:$0xf] %vm1375_vm4, %v1372_v41 }

</bundles_post_ra>
